<compile_context>
chip_gen: v7x
topology: tpu7x:2x2x1
jax: 0.10.0
libtpu: 0.0.40
codegen_flags: <defaults>
</compile_context>

<pallas_src>
import jax
import jax.numpy as jnp
from jax.experimental import pallas as pl
from jax.experimental.pallas import tpu as pltpu

EPSILON = 0.01
LANES = 128
BLOCK_ROWS = 1024  # 1024 x 128 f32 = 512 KiB/buffer; ~2 MiB with in/out
                   # double-buffering -> far under the 32 MiB scoped VMEM
                   # default on v5e / v6e / v7x, so no vmem_limit_bytes needed.


def _clip_kernel(x_ref, o_ref):
    # float cast + clip to [epsilon, 1 - epsilon]  (torch .float() + torch.clip)
    x = x_ref[...].astype(jnp.float32)
    o_ref[...] = jnp.clip(x, EPSILON, 1.0 - EPSILON)


def _cdiv(a, b):
    return -(-a // b)


def _preprocess_probs_pallas(flat):
    """flat: 1-D probability vector in its ORIGINAL dtype.

    Returns an (n, 1) float32 column matching
    torch.clip(probs.view(-1, 1).float(), eps, 1 - eps).
    """
    n = flat.shape[0]
    rows = _cdiv(n, LANES)

    if rows <= BLOCK_ROWS:
        # Small input: single block covering the whole padded slab — removes
        # all per-grid-step overhead; one contiguous DMA in, one out.
        block_rows = rows
        grid = (1,)
    else:
        # Large input: 1024-row lane-dense tiles; grid length is >= 2, so the
        # "parallel" axis can be sharded across v7x's two TensorCores.
        block_rows = BLOCK_ROWS
        rows = _cdiv(rows, BLOCK_ROWS) * BLOCK_ROWS
        grid = (rows // BLOCK_ROWS,)

    pad = rows * LANES - n
    # Single input-side pass, in the SOURCE dtype (no wrapper f32 copy for
    # bf16/fp16 inputs — the cast happens inside the kernel).
    slab = jnp.pad(flat, (0, pad)).reshape(rows, LANES)

    clipped = pl.pallas_call(
        _clip_kernel,
        out_shape=jax.ShapeDtypeStruct((rows, LANES), jnp.float32),
        grid=grid,
        in_specs=[pl.BlockSpec((block_rows, LANES), lambda i: (i, 0))],
        out_specs=pl.BlockSpec((block_rows, LANES), lambda i: (i, 0)),
        compiler_params=pltpu.CompilerParams(
            dimension_semantics=("parallel",)
        ),
    )(slab)

    # Single output-side pass: contiguous reshape (layout no-op) + one slice.
    return jax.lax.slice(clipped.reshape(rows * LANES, 1), (0, 0), (n, 1))


class Calibrator:
    """JAX/Pallas port of opencood Calibrator (base class)."""

    def __init__(self):
        self.epsilon = EPSILON  # matches PyTorch __init__ (no learnable params)

    def preprocess_probs(self, probs):
        flat = jnp.asarray(probs).reshape(-1)
        return _preprocess_probs_pallas(flat)

    def preprocess_labels(self, labels):
        return jnp.asarray(labels).reshape(-1, 1).astype(jnp.float32)

    def forward(self, probs):
        # TODO(synk): base-class forward() raises NotImplementedError in PyTorch;
        # subclasses define the calibration map. The only concrete compute in the
        # base class is preprocess_probs (cast + clip), which is what runs here.
        return self.preprocess_probs(probs)


if __name__ == "__main__":
    key = jax.random.PRNGKey(0)
    k1, k2 = jax.random.split(key)

    calib = Calibrator()

    # 1) Small f32 prob map, e.g. a (B, C, H, W) detection-confidence tensor.
    #    2048 elements -> 16 rows -> single-block path.
    x = jax.random.uniform(k1, (2, 4, 16, 16), dtype=jnp.float32)
    out = jax.block_until_ready(calib.forward(x))
    ref = jnp.clip(x.reshape(-1, 1).astype(jnp.float32), EPSILON, 1.0 - EPSILON)
    assert out.shape == (2 * 4 * 16 * 16, 1), out.shape
    assert out.dtype == jnp.float32
    assert jnp.max(jnp.abs(out - ref)) < 1e-6

    # 2) Moderately larger bf16 input -> exercises the tiled path (grid >= 2)
    #    and the in-kernel float cast.
    x2 = jax.random.uniform(k2, (3, 100, 512), dtype=jnp.float32).astype(jnp.bfloat16)
    out2 = jax.block_until_ready(calib.forward(x2))
    ref2 = jnp.clip(x2.reshape(-1, 1).astype(jnp.float32), EPSILON, 1.0 - EPSILON)
    assert out2.shape == (3 * 100 * 512, 1), out2.shape
    assert out2.dtype == jnp.float32
    assert jnp.max(jnp.abs(out2 - ref2)) < 1e-6

    print("KERNEL_OK")
</pallas_src>

<mosaic_0001>
module attributes {stable_mosaic.version = 11 : i64} {
  func.func @_clip_kernel(%arg0: i32, %arg1: memref<16x128xf32, #tpu.memory_space<vmem>>, %arg2: memref<16x128xf32, #tpu.memory_space<vmem>>) attributes {dimension_semantics = [#tpu.dimension_semantics<parallel>], iteration_bounds = array<i64: 1>, scalar_prefetch = 0 : i64, scratch_operands = 0 : i64, tpu.core_type = #tpu.core_type<tc>, window_params = [{transform_indices = @transform_0, window_bounds = array<i64: 16, 128>}, {transform_indices = @transform_1, window_bounds = array<i64: 16, 128>}]} {
    %c0 = arith.constant 0 : index
    %c0_0 = arith.constant 0 : index
    %0 = vector.load %arg1[%c0, %c0_0] : memref<16x128xf32, #tpu.memory_space<vmem>>, vector<16x128xf32>
    %cst = arith.constant 0.00999999977 : f32
    %cst_1 = arith.constant 9.900000e-01 : f32
    %1 = vector.broadcast %cst : f32 to vector<16x128xf32>
    %2 = arith.maximumf %1, %0 : vector<16x128xf32>
    %3 = vector.broadcast %cst_1 : f32 to vector<16x128xf32>
    %4 = arith.minimumf %3, %2 : vector<16x128xf32>
    %c0_2 = arith.constant 0 : index
    %c0_3 = arith.constant 0 : index
    %5 = vector.load %arg2[%c0_2, %c0_3] : memref<16x128xf32, #tpu.memory_space<vmem>>, vector<16x128xf32>
    tpu.vector_store %arg2[%c0_2, %c0_3], %4 {strides = array<i32>} : memref<16x128xf32, #tpu.memory_space<vmem>>, vector<16x128xf32>,
    return
  }
  func.func @transform_0(%arg0: i32) -> (i32, i32) {
    %c0_i32 = arith.constant 0 : i32
    %c0_i32_0 = arith.constant 0 : i32
    return %arg0, %c0_i32 : i32, i32
  }
  func.func @transform_1(%arg0: i32) -> (i32, i32) {
    %c0_i32 = arith.constant 0 : i32
    %c0_i32_0 = arith.constant 0 : i32
    return %arg0, %c0_i32 : i32, i32
  }
}

</mosaic_0001>

<bundles_post_ra>
// kernel: tpu_custom_call.1
= control target key start
LH: loop header
LB: loop body
LE: loop exit
PB: predicated region body
PF: predicated region fallthrough
CT: control target
= control target key end

     0   :  { %6 = vsyncpa [#allocation3], 0  ;;  %s144_s0 = inlined_call_operand.hbm [shape: f32[16,128], index: 0, kind: input, shape index: {}]   ;;  %s145_s1 = inlined_call_operand.hbm [shape: f32[16,128], index: 1, kind: output, shape index: {}]  }
   0x1   :  { %7 = vsyncpa [#allocation4], 0  ;;  %s100_s6 = smov [#allocation2]   ;;  %s52_s10 = scalar_lea.hbm %s144_s0, 256 }
   0x2   :  { %s13_s7 = sshll.u32 %s100_s6, 4  ;;  %p53_p0 = scmp.ne.s32.totalorder %s144_s0, %s52_s10  ;;  %s14_s7 = int_to_ptr.vmem [resolvable:$true] %s13_s7 }
   0x3   :  { %p56_p1 = scmp.lt.u32.totalorder %s52_s10, %s144_s0 }
   0x5   :  { %p58_p2 = pnand %p56_p1, %p53_p0 }
   0x7   :  { %61 = shalt.err (!%p58_p2)
}
   0x8   :  { %s62_s15 = scalar_lea.vmem %s14_s7, 256  ;;  %p67_p4 = scmp.lt.s32.totalorder %s14_s7, %s14_s7 }
   0x9   :  { %p63_p3 = scmp.ne.s32.totalorder %s14_s7, %s62_s15  ;;  %p68_p5 = scmp.lt.s32.totalorder %s62_s15, %s62_s15 }
   0xb   :  { %p69_p6 = por %p68_p5, %p67_p4 }
   0xd   :  { %p70_p7 = pnand %p69_p6, %p63_p3 }
   0xf   :  { %73 = shalt.err (!%p70_p7)
}
  0x10   :  { %s101_s16 = smov 128   ;;  %s102_s17 = smov 8  }
  0x11   :  { %19 = dma.hbm_to_vmem [thread:$0]  %s144_s0, 256, %s14_s7, [#allocation3], %s101_s16, %s101_s16, %s102_s17  }
  0x12   :  { %96 = dma.done.wait [#allocation3], 256  }
  0x13   :  { %97 = vsyncadd [#allocation3], 4294967040  ;;  %v23_v0 = vld [vmem:[#allocation2] sm:$0xff]  ;;  %v24_v1 = vld [vmem:[#allocation2 + $0x8] sm:$0xff]  ;;  %s103_s20 = smov [#allocation5]  }
  0x14   :  { %s36_s21 = sshll.u32 %s103_s20, 4  ;;  %v25_v2 = vmax.f32 %v23_v0, 0.01  ;;  %v26_v3 = vmax.f32 %v24_v1, 0.01  ;;  %s37_s21 = int_to_ptr.vmem [resolvable:$true] %s36_s21 }
  0x15   :  { %s74_s22 = scalar_lea.vmem %s37_s21, 256  ;;  %p79_p9 = scmp.lt.s32.totalorder %s37_s21, %s37_s21 }
  0x16   :  { %v27_v4 = vmin.f32 %v25_v2, 0.99  ;;  %v28_v5 = vmin.f32 %v26_v3, 0.99  ;;  %p75_p8 = scmp.ne.s32.totalorder %s37_s21, %s74_s22  ;;  %p80_p10 = scmp.lt.s32.totalorder %s74_s22, %s74_s22 }
  0x18   :  { %29 = vst [vmem:[#allocation5] sm:$0xff] %v27_v4  ;;  %30 = vst [vmem:[#allocation5 + $0x8] sm:$0xff] %v28_v5  ;;  %p81_p11 = por %p80_p10, %p79_p9 }
  0x1a   :  { %p82_p12 = pnand %p81_p11, %p75_p8 }
  0x1c   :  { %85 = shalt.err (!%p82_p12)
}
  0x1d   :  { %s86_s24 = scalar_lea.hbm %s145_s1, 256 }
  0x1e   :  { %p87_p13 = scmp.ne.s32.totalorder %s145_s1, %s86_s24  ;;  %p90_p0 = scmp.lt.u32.totalorder %s86_s24, %s145_s1 }
  0x20   :  { %p92_p1 = pnand %p90_p0, %p87_p13 }
  0x22   :  { %95 = shalt.err (!%p92_p1)
}
  0x23   :  { %42 = dma.vmem_to_hbm [thread:$0]  %s37_s21, 256, %s145_s1, [#allocation4], %s101_s16, %s101_s16, %s102_s17  }
  0x24   :  { %98 = dma.done.wait [#allocation4], 256  }
  0x25   :  { %99 = vsyncadd [#allocation4], 4294967040 }
  0x26   :  { %46 = vsyncpa [#allocation3], 1 }
  0x27   :  { %47 = vsyncpa [#allocation4], 1 }

</bundles_post_ra>
